<compile_context>
chip_gen: v5e
topology: v5e:2x2
jax: 0.10.0
libtpu: 0.0.40
codegen_flags: <defaults>
</compile_context>

<pallas_src>
import jax
import jax.numpy as jnp
from jax.experimental import pallas as pl
from jax.experimental.pallas import tpu as pltpu


def _round_up(v, m):
    return ((v + m - 1) // m) * m


def _mnist_flex_kernel(x_ref, w1_ref, b1_ref, w2_ref, b2_ref, o_ref):
    # (TB, 784) f32 tile -> bf16 cast on the VPU (hidden under the MXU).
    x = x_ref[...].astype(jnp.bfloat16)

    # Hidden layer on the MXU: (TB, 784) @ (784, Hp), bf16 operands, f32 acc.
    h = jnp.dot(x, w1_ref[...], preferred_element_type=jnp.float32)
    h = jnp.maximum(h + b1_ref[...], 0.0)                       # bias + ReLU

    # Output layer: W2 already carries the sigmoid(x0 - arange)*scaler gate,
    # folded once in the wrapper. Lane-dense (TB, 128) f32 store.
    o_ref[...] = jnp.dot(h.astype(jnp.bfloat16), w2_ref[...],
                         preferred_element_type=jnp.float32) + b2_ref[...]


def mnist_1h_flexible_scaled_forward(x_nchw, params, *, max_tb=256):
    """x_nchw: (B, 1, 28, 28) float32. Returns (B, 10) float32."""
    B = x_nchw.shape[0]
    D = 28 * 28
    NOUT = 10
    NP = 128                                       # padded output lane width

    x2 = x_nchw.reshape(B, D).astype(jnp.float32)  # same as torch .view(-1, 784)

    w1, b1 = params["w1"], params["b1"]            # (784, H), (H,)
    scaler, x0 = params["scaler"], params["x0"]    # (H,), (1,)
    w2, b2 = params["w2"], params["b2"]            # (H, 10), (10,)
    H = w1.shape[1]
    Hp = max(128, _round_up(H, 128))

    # ---- Hoisted, loop-invariant prep (runs once, outside the grid loop) ----
    # get_total_factor() folded into W2:  (h * f) @ W2 == h @ (diag(f) @ W2)
    # with f = sigmoid(-(arange(H) - x_0)) * scaler.
    rng = jnp.arange(H, dtype=jnp.float32)
    factor = jax.nn.sigmoid(x0[0] - rng) * scaler                # (H,) f32
    w2f = w2.astype(jnp.float32) * factor[:, None]               # (H, 10) f32

    w1p = jnp.pad(w1.astype(jnp.bfloat16), ((0, 0), (0, Hp - H)))
    b1p = jnp.pad(b1.reshape(1, H).astype(jnp.float32), ((0, 0), (0, Hp - H)))
    w2p = jnp.pad(w2f.astype(jnp.bfloat16), ((0, Hp - H), (0, NP - NOUT)))
    b2p = jnp.pad(b2.reshape(1, NOUT).astype(jnp.float32),
                  ((0, 0), (0, NP - NOUT)))

    # ---- Batch tiling: 16-sublane multiples; >=2 grid steps when possible ----
    TB = min(max_tb, _round_up(B, 16))
    B_pad = _round_up(B, TB)
    if B_pad // TB < 2 and B_pad >= 32:            # feed both v7x TensorCores
        TB = max(16, _round_up(B_pad // 2, 16))
        B_pad = _round_up(B, TB)
    grid = (B_pad // TB,)

    x_pad = x2 if B_pad == B else jnp.pad(x2, ((0, B_pad - B), (0, 0)))

    # ---- VMEM budget (worst case: everything double-buffered) ----
    vmem_est = (2 * TB * D * 4            # x tiles, f32
                + 2 * TB * NP * 4         # out tiles, f32
                + 2 * D * Hp * 2          # W1, bf16
                + 2 * Hp * NP * 2         # W2, bf16
                + 2 * (Hp + NP) * 4)      # biases, f32
    try:
        vmem_cap = int(getattr(pltpu.get_tpu_info(), "vmem_capacity_bytes",
                               64 * 1024 * 1024))
    except Exception:
        vmem_cap = 64 * 1024 * 1024
    vmem_limit = int(min(max(32 * 1024 * 1024, 2 * vmem_est),
                         (vmem_cap * 7) // 8))

    cost = pl.CostEstimate(
        flops=2 * B_pad * D * Hp + 2 * B_pad * Hp * NP,
        transcendentals=0,
        bytes_accessed=(x_pad.size * 4 + w1p.size * 2 + w2p.size * 2
                        + b1p.size * 4 + b2p.size * 4 + B_pad * NP * 4),
    )

    def call(single_buffer_weights):
        def resident(shape):
            # Constant index_map -> weights stay VMEM-resident across steps.
            if single_buffer_weights:
                return pl.BlockSpec(shape, lambda i: (0, 0),
                                    pipeline_mode=pl.Buffered(1))
            return pl.BlockSpec(shape, lambda i: (0, 0))

        return pl.pallas_call(
            _mnist_flex_kernel,
            out_shape=jax.ShapeDtypeStruct((B_pad, NP), jnp.float32),
            grid=grid,
            in_specs=[
                pl.BlockSpec((TB, D), lambda i: (i, 0)),   # x tile (pipelined)
                resident((D, Hp)),                         # W1
                resident((1, Hp)),                         # b1
                resident((Hp, NP)),                        # W2 (gate-folded)
                resident((1, NP)),                         # b2
            ],
            out_specs=pl.BlockSpec((TB, NP), lambda i: (i, 0)),
            compiler_params=pltpu.CompilerParams(
                dimension_semantics=("parallel",),
                vmem_limit_bytes=vmem_limit,
            ),
            cost_estimate=cost,
        )(x_pad, w1p, b1p, w2p, b2p)

    try:
        out = call(True)      # single-buffered resident weights (VMEM headroom)
    except Exception:
        out = call(False)     # fall back to default double-buffering

    return out[:B, :NOUT]


def init_params(key, size):
    """Deterministic init mirroring the torch module's parameter shapes."""
    k1, k2, k3, k4 = jax.random.split(key, 4)
    fan1 = 28 * 28
    bound1 = 1.0 / jnp.sqrt(fan1)
    bound2 = 1.0 / jnp.sqrt(size)
    return {
        # hidden_layer = nn.Linear(784, size) -> stored transposed (784, size)
        "w1": jax.random.uniform(k1, (fan1, size), jnp.float32, -bound1, bound1),
        "b1": jax.random.uniform(k2, (size,), jnp.float32, -bound1, bound1),
        # scaler = ones(size), x_0 = size (default x=size)
        "scaler": jnp.ones((size,), jnp.float32),
        "x0": jnp.full((1,), float(size), jnp.float32),
        # output_layer = nn.Linear(size, 10) -> stored transposed (size, 10)
        "w2": jax.random.uniform(k3, (size, 10), jnp.float32, -bound2, bound2),
        "b2": jax.random.uniform(k4, (10,), jnp.float32, -bound2, bound2),
    }


def _reference_forward(x_nchw, params):
    B = x_nchw.shape[0]
    x2 = x_nchw.reshape(B, 28 * 28)
    h = jnp.maximum(x2 @ params["w1"] + params["b1"], 0.0)
    H = params["w1"].shape[1]
    rng = jnp.arange(H, dtype=jnp.float32)
    selector = jax.nn.sigmoid(-(rng - params["x0"][0]))
    h = h * (selector * params["scaler"])
    return h @ params["w2"] + params["b2"]


if __name__ == "__main__":
    key = jax.random.PRNGKey(0)
    k_param, k_x = jax.random.split(key)

    SIZE = 32   # hidden width ("size" in the torch module)
    B = 8       # batch

    params = init_params(k_param, SIZE)
    x = jax.random.normal(k_x, (B, 1, 28, 28), jnp.float32)

    y = mnist_1h_flexible_scaled_forward(x, params)
    y = jax.block_until_ready(y)

    y_ref = _reference_forward(x, params)
    assert y.shape == (B, 10)
    # bf16 MXU operands with f32 accumulation -> loose-but-safe tolerance.
    assert jnp.allclose(y, y_ref, atol=5e-2, rtol=5e-2), (
        float(jnp.max(jnp.abs(y - y_ref))))

    print("KERNEL_OK")
</pallas_src>

<mosaic_0001>
module attributes {stable_mosaic.version = 11 : i64} {
  func.func @_mnist_flex_kernel(%arg0: i32, %arg1: memref<16x784xf32, #tpu.memory_space<vmem>>, %arg2: memref<784x128xbf16, #tpu.memory_space<vmem>>, %arg3: memref<1x128xf32, #tpu.memory_space<vmem>>, %arg4: memref<128x128xbf16, #tpu.memory_space<vmem>>, %arg5: memref<1x128xf32, #tpu.memory_space<vmem>>, %arg6: memref<16x128xf32, #tpu.memory_space<vmem>>) attributes {dimension_semantics = [#tpu.dimension_semantics<parallel>], iteration_bounds = array<i64: 1>, scalar_prefetch = 0 : i64, scratch_operands = 0 : i64, tpu.core_type = #tpu.core_type<tc>, window_params = [{transform_indices = @transform_0, window_bounds = array<i64: 16, 784>}, {pipeline_mode = #tpu.pipeline_mode<synchronous>, transform_indices = @transform_1, window_bounds = array<i64: 784, 128>}, {pipeline_mode = #tpu.pipeline_mode<synchronous>, transform_indices = @transform_2, window_bounds = array<i64: 1, 128>}, {pipeline_mode = #tpu.pipeline_mode<synchronous>, transform_indices = @transform_3, window_bounds = array<i64: 128, 128>}, {pipeline_mode = #tpu.pipeline_mode<synchronous>, transform_indices = @transform_4, window_bounds = array<i64: 1, 128>}, {transform_indices = @transform_5, window_bounds = array<i64: 16, 128>}]} {
    %c0 = arith.constant 0 : index
    %c0_0 = arith.constant 0 : index
    %0 = vector.load %arg1[%c0, %c0_0] : memref<16x784xf32, #tpu.memory_space<vmem>>, vector<16x784xf32>
    %1 = arith.truncf %0 : vector<16x784xf32> to vector<16x784xbf16>
    %c0_1 = arith.constant 0 : index
    %c0_2 = arith.constant 0 : index
    %2 = vector.load %arg2[%c0_1, %c0_2] : memref<784x128xbf16, #tpu.memory_space<vmem>>, vector<784x128xbf16>
    %cst = arith.constant dense<0.000000e+00> : vector<16x128xf32>
    %3 = tpu.matmul %1, %2, %cst {dimension_numbers = #tpu.dot_dimension_numbers<[1], [0], [0], [1], [0, 0, 1, 1], [], []>} : vector<16x784xbf16>, vector<784x128xbf16>, vector<16x128xf32> -> vector<16x128xf32>
    %c0_3 = arith.constant 0 : index
    %c0_4 = arith.constant 0 : index
    %4 = vector.load %arg3[%c0_3, %c0_4] : memref<1x128xf32, #tpu.memory_space<vmem>>, vector<1x128xf32>
    %5 = vector.broadcast %4 : vector<1x128xf32> to vector<16x128xf32>
    %6 = arith.addf %3, %5 : vector<16x128xf32>
    %cst_5 = arith.constant 0.000000e+00 : f32
    %7 = vector.broadcast %cst_5 : f32 to vector<16x128xf32>
    %8 = arith.maximumf %6, %7 : vector<16x128xf32>
    %9 = arith.truncf %8 : vector<16x128xf32> to vector<16x128xbf16>
    %c0_6 = arith.constant 0 : index
    %c0_7 = arith.constant 0 : index
    %10 = vector.load %arg4[%c0_6, %c0_7] : memref<128x128xbf16, #tpu.memory_space<vmem>>, vector<128x128xbf16>
    %cst_8 = arith.constant dense<0.000000e+00> : vector<16x128xf32>
    %11 = tpu.matmul %9, %10, %cst_8 {dimension_numbers = #tpu.dot_dimension_numbers<[1], [0], [0], [1], [0, 0, 1, 1], [], []>} : vector<16x128xbf16>, vector<128x128xbf16>, vector<16x128xf32> -> vector<16x128xf32>
    %c0_9 = arith.constant 0 : index
    %c0_10 = arith.constant 0 : index
    %12 = vector.load %arg5[%c0_9, %c0_10] : memref<1x128xf32, #tpu.memory_space<vmem>>, vector<1x128xf32>
    %13 = vector.broadcast %12 : vector<1x128xf32> to vector<16x128xf32>
    %14 = arith.addf %11, %13 : vector<16x128xf32>
    %c0_11 = arith.constant 0 : index
    %c0_12 = arith.constant 0 : index
    %15 = vector.load %arg6[%c0_11, %c0_12] : memref<16x128xf32, #tpu.memory_space<vmem>>, vector<16x128xf32>
    tpu.vector_store %arg6[%c0_11, %c0_12], %14 {strides = array<i32>} : memref<16x128xf32, #tpu.memory_space<vmem>>, vector<16x128xf32>,
    return
  }
  func.func @transform_0(%arg0: i32) -> (i32, i32) {
    %c0_i32 = arith.constant 0 : i32
    %c0_i32_0 = arith.constant 0 : i32
    return %arg0, %c0_i32 : i32, i32
  }
  func.func @transform_1(%arg0: i32) -> (i32, i32) {
    %c0_i32 = arith.constant 0 : i32
    %c0_i32_0 = arith.constant 0 : i32
    %c0_i32_1 = arith.constant 0 : i32
    return %c0_i32, %c0_i32_0 : i32, i32
  }
  func.func @transform_2(%arg0: i32) -> (i32, i32) {
    %c0_i32 = arith.constant 0 : i32
    %c0_i32_0 = arith.constant 0 : i32
    %c0_i32_1 = arith.constant 0 : i32
    return %c0_i32, %c0_i32_0 : i32, i32
  }
  func.func @transform_3(%arg0: i32) -> (i32, i32) {
    %c0_i32 = arith.constant 0 : i32
    %c0_i32_0 = arith.constant 0 : i32
    %c0_i32_1 = arith.constant 0 : i32
    return %c0_i32, %c0_i32_0 : i32, i32
  }
  func.func @transform_4(%arg0: i32) -> (i32, i32) {
    %c0_i32 = arith.constant 0 : i32
    %c0_i32_0 = arith.constant 0 : i32
    %c0_i32_1 = arith.constant 0 : i32
    return %c0_i32, %c0_i32_0 : i32, i32
  }
  func.func @transform_5(%arg0: i32) -> (i32, i32) {
    %c0_i32 = arith.constant 0 : i32
    %c0_i32_0 = arith.constant 0 : i32
    return %arg0, %c0_i32 : i32, i32
  }
}

module attributes {stable_mosaic.version = 11 : i64} {
  func.func @_mnist_flex_kernel(%arg0: i32, %arg1: memref<16x784xf32, #tpu.memory_space<vmem>>, %arg2: memref<784x128xbf16, #tpu.memory_space<vmem>>, %arg3: memref<1x128xf32, #tpu.memory_space<vmem>>, %arg4: memref<128x128xbf16, #tpu.memory_space<vmem>>, %arg5: memref<1x128xf32, #tpu.memory_space<vmem>>, %arg6: memref<16x128xf32, #tpu.memory_space<vmem>>) attributes {dimension_semantics = [#tpu.dimension_semantics<parallel>], iteration_bounds = array<i64: 1>, scalar_prefetch = 0 : i64, scratch_operands = 0 : i64, tpu.core_type = #tpu.core_type<tc>, window_params = [{transform_indices = @transform_0, window_bounds = array<i64: 16, 784>}, {pipeline_mode = #tpu.pipeline_mode<synchronous>, transform_indices = @transform_1, window_bounds = array<i64: 784, 128>}, {pipeline_mode = #tpu.pipeline_mode<synchronous>, transform_indices = @transform_2, window_bounds = array<i64: 1, 128>}, {pipeline_mode = #tpu.pipeline_mode<synchronous>, transform_indices = @transform_3, window_bounds = array<i64: 128, 128>}, {pipeline_mode = #tpu.pipeline_mode<synchronous>, transform_indices = @transform_4, window_bounds = array<i64: 1, 128>}, {transform_indices = @transform_5, window_bounds = array<i64: 16, 128>}]} {
    %c0 = arith.constant 0 : index
    %c0_0 = arith.constant 0 : index
    %0 = vector.load %arg1[%c0, %c0_0] : memref<16x784xf32, #tpu.memory_space<vmem>>, vector<16x784xf32>
    %1 = arith.truncf %0 : vector<16x784xf32> to vector<16x784xbf16>
    %c0_1 = arith.constant 0 : index
    %c0_2 = arith.constant 0 : index
    %2 = vector.load %arg2[%c0_1, %c0_2] : memref<784x128xbf16, #tpu.memory_space<vmem>>, vector<784x128xbf16>
    %cst = arith.constant dense<0.000000e+00> : vector<16x128xf32>
    %3 = tpu.matmul %1, %2, %cst {dimension_numbers = #tpu.dot_dimension_numbers<[1], [0], [0], [1], [0, 0, 1, 1], [], []>} : vector<16x784xbf16>, vector<784x128xbf16>, vector<16x128xf32> -> vector<16x128xf32>
    %c0_3 = arith.constant 0 : index
    %c0_4 = arith.constant 0 : index
    %4 = vector.load %arg3[%c0_3, %c0_4] : memref<1x128xf32, #tpu.memory_space<vmem>>, vector<1x128xf32>
    %5 = vector.broadcast %4 : vector<1x128xf32> to vector<16x128xf32>
    %6 = arith.addf %3, %5 : vector<16x128xf32>
    %cst_5 = arith.constant 0.000000e+00 : f32
    %7 = vector.broadcast %cst_5 : f32 to vector<16x128xf32>
    %8 = arith.maximumf %6, %7 : vector<16x128xf32>
    %9 = arith.truncf %8 : vector<16x128xf32> to vector<16x128xbf16>
    %c0_6 = arith.constant 0 : index
    %c0_7 = arith.constant 0 : index
    %10 = vector.load %arg4[%c0_6, %c0_7] : memref<128x128xbf16, #tpu.memory_space<vmem>>, vector<128x128xbf16>
    %cst_8 = arith.constant dense<0.000000e+00> : vector<16x128xf32>
    %11 = tpu.matmul %9, %10, %cst_8 {dimension_numbers = #tpu.dot_dimension_numbers<[1], [0], [0], [1], [0, 0, 1, 1], [], []>} : vector<16x128xbf16>, vector<128x128xbf16>, vector<16x128xf32> -> vector<16x128xf32>
    %c0_9 = arith.constant 0 : index
    %c0_10 = arith.constant 0 : index
    %12 = vector.load %arg5[%c0_9, %c0_10] : memref<1x128xf32, #tpu.memory_space<vmem>>, vector<1x128xf32>
    %13 = vector.broadcast %12 : vector<1x128xf32> to vector<16x128xf32>
    %14 = arith.addf %11, %13 : vector<16x128xf32>
    %c0_11 = arith.constant 0 : index
    %c0_12 = arith.constant 0 : index
    %15 = vector.load %arg6[%c0_11, %c0_12] : memref<16x128xf32, #tpu.memory_space<vmem>>, vector<16x128xf32>
    tpu.vector_store %arg6[%c0_11, %c0_12], %14 {strides = array<i32>} : memref<16x128xf32, #tpu.memory_space<vmem>>, vector<16x128xf32>,
    return
  }
  func.func @transform_0(%arg0: i32) -> (i32, i32) {
    %c0_i32 = arith.constant 0 : i32
    %c0_i32_0 = arith.constant 0 : i32
    return %arg0, %c0_i32 : i32, i32
  }
  func.func @transform_1(%arg0: i32) -> (i32, i32) {
    %c0_i32 = arith.constant 0 : i32
    %c0_i32_0 = arith.constant 0 : i32
    %c0_i32_1 = arith.constant 0 : i32
    return %c0_i32, %c0_i32_0 : i32, i32
  }
  func.func @transform_2(%arg0: i32) -> (i32, i32) {
    %c0_i32 = arith.constant 0 : i32
    %c0_i32_0 = arith.constant 0 : i32
    %c0_i32_1 = arith.constant 0 : i32
    return %c0_i32, %c0_i32_0 : i32, i32
  }
  func.func @transform_3(%arg0: i32) -> (i32, i32) {
    %c0_i32 = arith.constant 0 : i32
    %c0_i32_0 = arith.constant 0 : i32
    %c0_i32_1 = arith.constant 0 : i32
    return %c0_i32, %c0_i32_0 : i32, i32
  }
  func.func @transform_4(%arg0: i32) -> (i32, i32) {
    %c0_i32 = arith.constant 0 : i32
    %c0_i32_0 = arith.constant 0 : i32
    %c0_i32_1 = arith.constant 0 : i32
    return %c0_i32, %c0_i32_0 : i32, i32
  }
  func.func @transform_5(%arg0: i32) -> (i32, i32) {
    %c0_i32 = arith.constant 0 : i32
    %c0_i32_0 = arith.constant 0 : i32
    return %arg0, %c0_i32 : i32, i32
  }
}

</mosaic_0001>

<bundles_post_ra>
// kernel: tpu_custom_call.1
= control target key start
LH: loop header
LB: loop body
LE: loop exit
PB: predicated region body
PF: predicated region fallthrough
CT: control target
= control target key end

     0   :  { %10 = vsyncpa [#allocation3], 0  ;;  %s1153_s0 = inlined_call_operand.hbm [shape: f32[16,784], index: 0, kind: input, shape index: {}]   ;;  %s1154_s1 = inlined_call_operand.hbm [shape: bf16[784,128], index: 1, kind: input, shape index: {}]   ;;  %s1155_s2 = inlined_call_operand.vmem [shape: f32[1,128], index: 2, kind: input, shape index: {}]   ;;  %s1156_s3 = inlined_call_operand.hbm [shape: bf16[128,128], index: 3, kind: input, shape index: {}]   ;;  %s1157_s4 = inlined_call_operand.vmem [shape: f32[1,128], index: 4, kind: input, shape index: {}]   ;;  %s1158_s5 = inlined_call_operand.hbm [shape: f32[16,128], index: 5, kind: output, shape index: {}]  }
   0x1   :  { %11 = vsyncpa [#allocation6], 0  ;;  %s30_s20 = sshll.u32 %s1154_s1, 4  ;;  %s31_s20 = int_to_ptr.hbm [resolvable:$true] %s30_s20 }
   0x2   :  { %12 = vsyncpa [#allocation4], 0  ;;  %s1095_s21 = smov [#allocation5]   ;;  %s17_s25 = sshll.u32 %s1153_s0, 4  ;;  %s18_s25 = int_to_ptr.hbm [resolvable:$true] %s17_s25 }
   0x3   :  { %s32_s22 = sshll.u32 %s1095_s21, 4  ;;  %s1096_s26 = smov 64   ;;  %s33_s22 = int_to_ptr.vmem [resolvable:$true] %s32_s22 }
   0x4   :  { %s1097_s27 = smov 4   ;;  %s1098_s28 = smov [#allocation2]  }
   0x5   :  { %38 = dma.hbm_to_vmem [thread:$0]  %s31_s20, 6272, %s33_s22, [#allocation6], %s1096_s26, %s1096_s26, %s1097_s27  }
   0x6   :  { %s19_s29 = sshll.u32 %s1098_s28, 4  ;;  %s1099_s30 = smov 896   ;;  %s20_s29 = int_to_ptr.vmem [resolvable:$true] %s19_s29 }
   0x7   :  { %s1100_s6 = smov 56   ;;  %s45_s8 = sshll.u32 %s1156_s3, 4  ;;  %s46_s8 = int_to_ptr.hbm [resolvable:$true] %s45_s8 }
   0x8   :  { %25 = dma.hbm_to_vmem [thread:$0]  %s18_s25, 1792, %s20_s29, [#allocation3], %s1099_s30, %s1099_s30, %s1100_s6  }
   0x9   :  { %s1101_s9 = smov [#allocation7]  }
   0xa   :  { %s47_s10 = sshll.u32 %s1101_s9, 4  ;;  %s48_s10 = int_to_ptr.vmem [resolvable:$true] %s47_s10 }
   0xb   :  { %53 = dma.hbm_to_vmem [thread:$0]  %s46_s8, 1024, %s48_s10, [#allocation6], %s1096_s26, %s1096_s26, %s1097_s27  }
   0xc   :  { %1089 = dma.done.wait [#allocation3], 1792  }
   0xd   :  { %1090 = vsyncadd [#allocation3], 4294965504 }
   0xe   :  { %1091 = dma.done.wait [#allocation6], 7296  }
   0xf   :  { %1092 = vsyncadd [#allocation6], 4294960000  ;;  %v931_v0 = vld [vmem:[#allocation5 + $0x38] sm:$0xff]  ;;  %v930_v4 = vld [vmem:[#allocation5 + $0x30] sm:$0xff]  ;;  %vm486_vm0 = vcmask 130048   ;;  %s1102_s12 = smov [#allocation8]  }
  0x10   :  { %v939_v1 = vld [vmem:[#allocation5 + $0x78] sm:$0xff]  ;;  %490 = vmatpush.bf16.msra.mxu0 %v931_v0  ;;  %v938_v5 = vld [vmem:[#allocation5 + $0x70] sm:$0xff]  ;;  %v929_v8 = vld [vmem:[#allocation5 + $0x28] sm:$0xff]  ;;  %s679_s13 = sshll.u32 %s1102_s12, 4  ;;  %s681_s16 = sshll.u32 %s1158_s5, 4  ;;  %s680_s13 = int_to_ptr.vmem [resolvable:$true] %s679_s13  ;;  %s682_s16 = int_to_ptr.hbm [resolvable:$true] %s681_s16 }
  0x11   :  { %v947_v2 = vld [vmem:[#allocation5 + $0xb8] sm:$0xff]  ;;  %504 = vmatpush.bf16.msra.mxu1 %v939_v1  ;;  %v946_v6 = vld [vmem:[#allocation5 + $0xb0] sm:$0xff]  ;;  %v937_v9 = vld [vmem:[#allocation5 + $0x68] sm:$0xff]  ;;  %s1103_s17 = smov 128   ;;  %s1104_s18 = smov 8  }
  0x12   :  { %v955_v3 = vld [vmem:[#allocation5 + $0xf8] sm:$0xff]  ;;  %518 = vmatpush.bf16.msra.mxu2 %v947_v2  ;;  %v954_v7 = vld [vmem:[#allocation5 + $0xf0] sm:$0xff]  ;;  %v945_v10 = vld [vmem:[#allocation5 + $0xa8] sm:$0xff] }
  0x13   :  { %532 = vmatpush.bf16.msra.mxu3 %v955_v3  ;;  %v953_v11 = vld [vmem:[#allocation5 + $0xe8] sm:$0xff]  ;;  %v928_v12 = vld [vmem:[#allocation5 + $0x20] sm:$0xff]  ;;  %v927_v16 = vld [vmem:[#allocation5 + $0x18] sm:$0xff] }
  0x14   :  { %491 = vmatpush.bf16.msra.mxu0 %v930_v4  ;;  %v936_v13 = vld [vmem:[#allocation5 + $0x60] sm:$0xff]  ;;  %v935_v17 = vld [vmem:[#allocation5 + $0x58] sm:$0xff]  ;;  %v926_v20 = vld [vmem:[#allocation5 + $0x10] sm:$0xff] }
  0x15   :  { %505 = vmatpush.bf16.msra.mxu1 %v938_v5  ;;  %v944_v14 = vld [vmem:[#allocation5 + $0xa0] sm:$0xff]  ;;  %v943_v18 = vld [vmem:[#allocation5 + $0x98] sm:$0xff]  ;;  %v934_v21 = vld [vmem:[#allocation5 + $0x50] sm:$0xff] }
  0x16   :  { %519 = vmatpush.bf16.msra.mxu2 %v946_v6  ;;  %v952_v15 = vld [vmem:[#allocation5 + $0xe0] sm:$0xff]  ;;  %v951_v19 = vld [vmem:[#allocation5 + $0xd8] sm:$0xff]  ;;  %v942_v22 = vld [vmem:[#allocation5 + $0x90] sm:$0xff] }
  0x17   :  { %533 = vmatpush.bf16.msra.mxu3 %v954_v7  ;;  %v950_v23 = vld [vmem:[#allocation5 + $0xd0] sm:$0xff]  ;;  %v925_v24 = vld [vmem:[#allocation5 + $0x8] sm:$0xff]  ;;  %v924_v28 = vld [vmem:[#allocation5] sm:$0xff] }
  0x18   :  { %492 = vmatpush.bf16.msra.mxu0 %v929_v8  ;;  %v933_v25 = vld [vmem:[#allocation5 + $0x48] sm:$0xff]  ;;  %v932_v29 = vld [vmem:[#allocation5 + $0x40] sm:$0xff]  ;;  %v69_v30 = vld [vmem:[#allocation2] sm:$0xff] }
  0x19   :  { %506 = vmatpush.bf16.msra.mxu1 %v937_v9  ;;  %v941_v26 = vld [vmem:[#allocation5 + $0x88] sm:$0xff]  ;;  %v70_v32 = vld [vmem:[#allocation2 + $0x8] sm:$0xff]  ;;  %v77_v33 = vld [vmem:[#allocation2 + $0x40] sm:$0xff] }
  0x1a   :  { %520 = vmatpush.bf16.msra.mxu2 %v945_v10  ;;  %v949_v27 = vld [vmem:[#allocation5 + $0xc8] sm:$0xff]  ;;  %v963_v34 = vld [vmem:[#allocation5 + $0x138] sm:$0xff]  ;;  %v940_v36 = vld [vmem:[#allocation5 + $0x80] sm:$0xff]  ;;  %v84_v43 = vpack.c.bf16 %v77_v33, %v70_v32 }
  0x1b   :  { %534 = vmatpush.bf16.msra.mxu3 %v953_v11  ;;  %v76_v31 = vld [vmem:[#allocation2 + $0x38] sm:$0xff]  ;;  %v971_v35 = vld [vmem:[#allocation5 + $0x178] sm:$0xff]  ;;  %v948_v37 = vld [vmem:[#allocation5 + $0xc0] sm:$0xff] }
  0x1c   :  { %493 = vmatpush.bf16.msra.mxu0 %v928_v12  ;;  %v71_v38 = vld [vmem:[#allocation2 + $0x10] sm:$0xff]  ;;  %v78_v39 = vld [vmem:[#allocation2 + $0x48] sm:$0xff]  ;;  %v83_v40 = vpack.c.bf16 %v76_v31, %v69_v30  ;;  %v72_v41 = vld [vmem:[#allocation2 + $0x18] sm:$0xff] }
  0x1d   :  { %507 = vmatpush.bf16.msra.mxu1 %v936_v13  ;;  %v79_v42 = vld [vmem:[#allocation2 + $0x50] sm:$0xff]  ;;  %v962_v45 = vld [vmem:[#allocation5 + $0x130] sm:$0xff]  ;;  %v85_v47 = vpack.c.bf16 %v78_v39, %v71_v38  ;;  %v961_v49 = vld [vmem:[#allocation5 + $0x128] sm:$0xff] }
  0x1e   :  { %521 = vmatpush.bf16.msra.mxu2 %v944_v14  ;;  %v972_v44 = vld [vmem:[#allocation5 + $0x180] sm:$0xff]  ;;  %v970_v46 = vld [vmem:[#allocation5 + $0x170] sm:$0xff]  ;;  %v86_v48 = vpack.c.bf16 %v79_v42, %v72_v41  ;;  %v969_v50 = vld [vmem:[#allocation5 + $0x168] sm:$0xff] }
  0x1f   :  { %535 = vmatpush.bf16.msra.mxu3 %v952_v15  ;;  %v960_v51 = vld [vmem:[#allocation5 + $0x120] sm:$0xff]  ;;  %v959_v53 = vld [vmem:[#allocation5 + $0x118] sm:$0xff]  ;;  %v958_v57 = vld [vmem:[#allocation5 + $0x110] sm:$0xff] }
  0x20   :  { %494 = vmatpush.bf16.msra.mxu0 %v927_v16  ;;  %v968_v52 = vld [vmem:[#allocation5 + $0x160] sm:$0xff]  ;;  %v967_v54 = vld [vmem:[#allocation5 + $0x158] sm:$0xff]  ;;  %v966_v58 = vld [vmem:[#allocation5 + $0x150] sm:$0xff] }
  0x21   :  { %508 = vmatpush.bf16.msra.mxu1 %v935_v17  ;;  %v75_v55 = vld [vmem:[#allocation2 + $0x30] sm:$0xff]  ;;  %v82_v56 = vld [vmem:[#allocation2 + $0x68] sm:$0xff]  ;;  %v957_v60 = vld [vmem:[#allocation5 + $0x108] sm:$0xff] }
  0x22   :  { %522 = vmatpush.bf16.msra.mxu2 %v943_v18  ;;  %v89_v59 = vpack.c.bf16 %v82_v56, %v75_v55  ;;  %v965_v61 = vld [vmem:[#allocation5 + $0x148] sm:$0xff]  ;;  %v956_v62 = vld [vmem:[#allocation5 + $0x100] sm:$0xff]  ;;  %v73_v0 = vld [vmem:[#allocation2 + $0x20] sm:$0xff] }
  0x23   :  { %536 = vmatpush.bf16.msra.mxu3 %v951_v19  ;;  %v964_v63 = vld [vmem:[#allocation5 + $0x140] sm:$0xff]  ;;  %v80_v1 = vld [vmem:[#allocation2 + $0x58] sm:$0xff]  ;;  %v74_v2 = vld [vmem:[#allocation2 + $0x28] sm:$0xff] }
  0x24   :  { %495 = vmatpush.bf16.msra.mxu0 %v926_v20  ;;  %v81_v3 = vld [vmem:[#allocation2 + $0x60] sm:$0xff]  ;;  %v87_v4 = vpack.c.bf16 %v80_v1, %v73_v0  ;;  %v980_v6 = vld [vmem:[#allocation7 + $0x38] sm:$0xff]  ;;  %v979_v7 = vld [vmem:[#allocation7 + $0x30] sm:$0xff] }
  0x25   :  { %509 = vmatpush.bf16.msra.mxu1 %v934_v21  ;;  %v88_v5 = vpack.c.bf16 %v81_v3, %v74_v2  ;;  %v978_v8 = vld [vmem:[#allocation7 + $0x28] sm:$0xff]  ;;  %v977_v9 = vld [vmem:[#allocation7 + $0x20] sm:$0xff]  ;;  %v976_v10 = vld [vmem:[#allocation7 + $0x18] sm:$0xff] }
  0x26   :  { %523 = vmatpush.bf16.msra.mxu2 %v942_v22  ;;  %v975_v11 = vld [vmem:[#allocation7 + $0x10] sm:$0xff]  ;;  %v974_v12 = vld [vmem:[#allocation7 + $0x8] sm:$0xff]  ;;  %v973_v16 = vld [vmem:[#allocation7] sm:$0xff] }
  0x27   :  { %537 = vmatpush.bf16.msra.mxu3 %v950_v23  ;;  %v991_v17 = vld [vmem:[%s1155_s2] ss:$0 sm:$0xff] }
  0x28   :  { %496 = vmatpush.bf16.msra.mxu0 %v925_v24 }
  0x29   :  { %510 = vmatpush.bf16.msra.mxu1 %v933_v25 }
  0x2a   :  { %524 = vmatpush.bf16.msra.mxu2 %v941_v26 }
  0x2b   :  { %538 = vmatpush.bf16.msra.mxu3 %v949_v27 }
  0x2c   :  { %497 = vmatpush.bf16.msra.mxu0 %v924_v28 }
  0x2d   :  { %511 = vmatpush.bf16.msra.mxu1 %v932_v29 }
  0x2e   :  { %525 = vmatpush.bf16.msra.mxu2 %v940_v36 }
  0x2f   :  { %539 = vmatpush.bf16.msra.mxu3 %v948_v37  ;;  %498 = vmatmul.bf16.vlgmr.msra.gmra.mxu0 %v83_v40 }
  0x30   :  { %546 = vmatpush.bf16.msrb.mxu0 %v963_v34  ;;  %512 = vmatmul.bf16.vlgmr.msra.gmra.mxu1 %v84_v43 }
  0x31   :  { %560 = vmatpush.bf16.msrb.mxu1 %v971_v35  ;;  %526 = vmatmul.bf16.vlgmr.msra.gmra.mxu2 %v85_v47 }
  0x32   :  { %581 = vmatpush.bf16.msrb.mxu2 %v972_v44  ;;  %540 = vmatmul.bf16.vlgmr.msra.gmra.mxu3 %v86_v48 }
  0x33   :  { %659 = vmatpush.bf16.msrb.mxu3 %v980_v6 }
  0x34   :  { %547 = vmatpush.bf16.msrb.mxu0 %v962_v45 }
  0x35   :  { %561 = vmatpush.bf16.msrb.mxu1 %v970_v46  ;;  %v992_v46 = vld [vmem:[%s1157_s4] ss:$0 sm:$0xff] }
  0x37   :  { %660 = vmatpush.bf16.msrb.mxu3 %v979_v7 }
  0x38   :  { %548 = vmatpush.bf16.msrb.mxu0 %v961_v49 }
  0x39   :  { %562 = vmatpush.bf16.msrb.mxu1 %v969_v50 }
  0x3b   :  { %661 = vmatpush.bf16.msrb.mxu3 %v978_v8 }
  0x3c   :  { %549 = vmatpush.bf16.msrb.mxu0 %v960_v51 }
  0x3d   :  { %563 = vmatpush.bf16.msrb.mxu1 %v968_v52 }
  0x3f   :  { %662 = vmatpush.bf16.msrb.mxu3 %v977_v9 }
  0x40   :  { %550 = vmatpush.bf16.msrb.mxu0 %v959_v53 }
  0x41   :  { %564 = vmatpush.bf16.msrb.mxu1 %v967_v54  ;;  %891 = vmatmul.msk.bf16.vlgmr.msrb.gmra.mxu2 %vm486_vm0, %v89_v59 }
  0x43   :  { %663 = vmatpush.bf16.msrb.mxu3 %v976_v10 }
  0x44   :  { %551 = vmatpush.bf16.msrb.mxu0 %v958_v57 }
  0x45   :  { %565 = vmatpush.bf16.msrb.mxu1 %v966_v58 }
  0x47   :  { %664 = vmatpush.bf16.msrb.mxu3 %v975_v11 }
  0x48   :  { %552 = vmatpush.bf16.msrb.mxu0 %v957_v60 }
  0x49   :  { %566 = vmatpush.bf16.msrb.mxu1 %v965_v61 }
  0x4b   :  { %665 = vmatpush.bf16.msrb.mxu3 %v974_v12 }
  0x4c   :  { %553 = vmatpush.bf16.msrb.mxu0 %v956_v62 }
  0x4d   :  { %567 = vmatpush.bf16.msrb.mxu1 %v964_v63 }
  0x4f   :  { %554 = vmatmul.bf16.vlgmr.msrb.gmra.mxu0 %v87_v4  ;;  %666 = vmatpush.bf16.msrb.mxu3 %v973_v16 }
  0x50   :  { %568 = vmatmul.bf16.vlgmr.msrb.gmra.mxu1 %v88_v5 }
  0xac   :  { %v499_v13 = vpop.f32.mrf.mxu0 }
  0xad   :  { %v513_v14 = vpop.f32.mrf.mxu1  ;;  %v500_v18 = vadd.f32 %v991_v17, %v499_v13 }
  0xaf   :  { %v514_v22 = vadd.f32 %v513_v14, %v500_v18 }
  0xb4   :  { %v527_v15 = vpop.f32.mrf.mxu2  ;;  %v501_v19 = vpop.f32.mrf.mxu0 }
  0xb5   :  { %v515_v20 = vpop.f32.mrf.mxu1  ;;  %v541_v23 = vpop.f32.mrf.mxu3  ;;  %v502_v24 = vadd.f32 %v991_v17, %v501_v19  ;;  %v528_v25 = vadd.f32 %v527_v15, %v514_v22 }
  0xb7   :  { %v516_v26 = vadd.f32 %v515_v20, %v502_v24  ;;  %v542_v29 = vadd.f32 %v541_v23, %v528_v25 }
  0xbc   :  { %v529_v21 = vpop.f32.mrf.mxu2 }
  0xbd   :  { %v530_v31 = vadd.f32 %v529_v21, %v516_v26  ;;  %v543_v33 = vpop.f32.mrf.mxu3 }
  0xbf   :  { %v544_v34 = vadd.f32 %v543_v33, %v530_v31 }
  0xc4   :  { %v583_v30 = vpop.f32.mrf.mxu2 }
  0xcc   :  { %v555_v27 = vpop.f32.mrf.mxu0  ;;  %v585_v41 = vpop.f32.mrf.mxu2 }
  0xcd   :  { %v569_v28 = vpop.f32.mrf.mxu1  ;;  %v556_v32 = vadd.f32 %v555_v27, %v542_v29 }
  0xcf   :  { %v570_v35 = vadd.f32 %v569_v28, %v556_v32 }
  0xd1   :  { %v584_v39 = vadd.f32 %v583_v30, %v570_v35 }
  0xd3   :  { %v588_v43 = vmax.f32 %v584_v39, 0.0 }
  0xd4   :  { %v557_v36 = vpop.f32.mrf.mxu0 }
  0xd5   :  { %v558_v37 = vadd.f32 %v557_v36, %v544_v34  ;;  %v571_v38 = vpop.f32.mrf.mxu1 }
  0xd7   :  { %v572_v40 = vadd.f32 %v571_v38, %v558_v37 }
  0xd9   :  { %v586_v42 = vadd.f32 %v585_v41, %v572_v40 }
  0xdb   :  { %v589_v44 = vmax.f32 %v586_v42, 0.0 }
  0xdd   :  { %v590_v45 = vpack.c.bf16 %v589_v44, %v588_v43 }
  0xdf   :  { %667 = vmatmul.bf16.vlgmr.msrb.gmra.mxu3 %v590_v45 }
 0x162   :  { %v668_v47 = vpop.f32.mrf.mxu3 }
 0x163   :  { %v669_v48 = vadd.f32 %v992_v46, %v668_v47 }
 0x165   :  { %673 = vst [vmem:[#allocation8] sm:$0xff] %v669_v48 }
 0x16a   :  { %v670_v49 = vpop.f32.mrf.mxu3 }
 0x16b   :  { %v671_v50 = vadd.f32 %v992_v46, %v670_v49 }
 0x16d   :  { %674 = vst [vmem:[#allocation8 + $0x8] sm:$0xff] %v671_v50 }
 0x16e   :  { %687 = dma.vmem_to_hbm [thread:$0]  %s680_s13, 256, %s682_s16, [#allocation4], %s1103_s17, %s1103_s17, %s1104_s18  }
 0x16f   :  { %1093 = dma.done.wait [#allocation4], 256  }
 0x170   :  { %1094 = vsyncadd [#allocation4], 4294967040 }
 0x171   :  { %692 = vsyncpa [#allocation3], 1 }
 0x172   :  { %693 = vsyncpa [#allocation6], 1 }
 0x173   :  { %694 = vsyncpa [#allocation4], 1 }

// kernel: tpu_custom_call.1
= control target key start
LH: loop header
LB: loop body
LE: loop exit
PB: predicated region body
PF: predicated region fallthrough
CT: control target
= control target key end

     0   :  { %10 = vsyncpa [#allocation3], 0  ;;  %s1153_s0 = inlined_call_operand.hbm [shape: f32[16,784], index: 0, kind: input, shape index: {}]   ;;  %s1154_s1 = inlined_call_operand.hbm [shape: bf16[784,128], index: 1, kind: input, shape index: {}]   ;;  %s1155_s2 = inlined_call_operand.vmem [shape: f32[1,128], index: 2, kind: input, shape index: {}]   ;;  %s1156_s3 = inlined_call_operand.hbm [shape: bf16[128,128], index: 3, kind: input, shape index: {}]   ;;  %s1157_s4 = inlined_call_operand.vmem [shape: f32[1,128], index: 4, kind: input, shape index: {}]   ;;  %s1158_s5 = inlined_call_operand.hbm [shape: f32[16,128], index: 5, kind: output, shape index: {}]  }
   0x1   :  { %11 = vsyncpa [#allocation6], 0  ;;  %s30_s20 = sshll.u32 %s1154_s1, 4  ;;  %s31_s20 = int_to_ptr.hbm [resolvable:$true] %s30_s20 }
   0x2   :  { %12 = vsyncpa [#allocation4], 0  ;;  %s1095_s21 = smov [#allocation5]   ;;  %s17_s25 = sshll.u32 %s1153_s0, 4  ;;  %s18_s25 = int_to_ptr.hbm [resolvable:$true] %s17_s25 }
   0x3   :  { %s32_s22 = sshll.u32 %s1095_s21, 4  ;;  %s1096_s26 = smov 64   ;;  %s33_s22 = int_to_ptr.vmem [resolvable:$true] %s32_s22 }
   0x4   :  { %s1097_s27 = smov 4   ;;  %s1098_s28 = smov [#allocation2]  }
   0x5   :  { %38 = dma.hbm_to_vmem [thread:$0]  %s31_s20, 6272, %s33_s22, [#allocation6], %s1096_s26, %s1096_s26, %s1097_s27  }
   0x6   :  { %s19_s29 = sshll.u32 %s1098_s28, 4  ;;  %s1099_s30 = smov 896   ;;  %s20_s29 = int_to_ptr.vmem [resolvable:$true] %s19_s29 }
   0x7   :  { %s1100_s6 = smov 56   ;;  %s45_s8 = sshll.u32 %s1156_s3, 4  ;;  %s46_s8 = int_to_ptr.hbm [resolvable:$true] %s45_s8 }
   0x8   :  { %25 = dma.hbm_to_vmem [thread:$0]  %s18_s25, 1792, %s20_s29, [#allocation3], %s1099_s30, %s1099_s30, %s1100_s6  }
   0x9   :  { %s1101_s9 = smov [#allocation7]  }
   0xa   :  { %s47_s10 = sshll.u32 %s1101_s9, 4  ;;  %s48_s10 = int_to_ptr.vmem [resolvable:$true] %s47_s10 }
   0xb   :  { %53 = dma.hbm_to_vmem [thread:$0]  %s46_s8, 1024, %s48_s10, [#allocation6], %s1096_s26, %s1096_s26, %s1097_s27  }
   0xc   :  { %1089 = dma.done.wait [#allocation3], 1792  }
   0xd   :  { %1090 = vsyncadd [#allocation3], 4294965504 }
   0xe   :  { %1091 = dma.done.wait [#allocation6], 7296  }
   0xf   :  { %1092 = vsyncadd [#allocation6], 4294960000  ;;  %v931_v0 = vld [vmem:[#allocation5 + $0x38] sm:$0xff]  ;;  %v930_v4 = vld [vmem:[#allocation5 + $0x30] sm:$0xff]  ;;  %vm486_vm0 = vcmask 130048   ;;  %s1102_s12 = smov [#allocation8]  }
  0x10   :  { %v939_v1 = vld [vmem:[#allocation5 + $0x78] sm:$0xff]  ;;  %490 = vmatpush.bf16.msra.mxu0 %v931_v0  ;;  %v938_v5 = vld [vmem:[#allocation5 + $0x70] sm:$0xff]  ;;  %v929_v8 = vld [vmem:[#allocation5 + $0x28] sm:$0xff]  ;;  %s679_s13 = sshll.u32 %s1102_s12, 4  ;;  %s681_s16 = sshll.u32 %s1158_s5, 4  ;;  %s680_s13 = int_to_ptr.vmem [resolvable:$true] %s679_s13  ;;  %s682_s16 = int_to_ptr.hbm [resolvable:$true] %s681_s16 }
  0x11   :  { %v947_v2 = vld [vmem:[#allocation5 + $0xb8] sm:$0xff]  ;;  %504 = vmatpush.bf16.msra.mxu1 %v939_v1  ;;  %v946_v6 = vld [vmem:[#allocation5 + $0xb0] sm:$0xff]  ;;  %v937_v9 = vld [vmem:[#allocation5 + $0x68] sm:$0xff]  ;;  %s1103_s17 = smov 128   ;;  %s1104_s18 = smov 8  }
  0x12   :  { %v955_v3 = vld [vmem:[#allocation5 + $0xf8] sm:$0xff]  ;;  %518 = vmatpush.bf16.msra.mxu2 %v947_v2  ;;  %v954_v7 = vld [vmem:[#allocation5 + $0xf0] sm:$0xff]  ;;  %v945_v10 = vld [vmem:[#allocation5 + $0xa8] sm:$0xff] }
  0x13   :  { %532 = vmatpush.bf16.msra.mxu3 %v955_v3  ;;  %v953_v11 = vld [vmem:[#allocation5 + $0xe8] sm:$0xff]  ;;  %v928_v12 = vld [vmem:[#allocation5 + $0x20] sm:$0xff]  ;;  %v927_v16 = vld [vmem:[#allocation5 + $0x18] sm:$0xff] }
  0x14   :  { %491 = vmatpush.bf16.msra.mxu0 %v930_v4  ;;  %v936_v13 = vld [vmem:[#allocation5 + $0x60] sm:$0xff]  ;;  %v935_v17 = vld [vmem:[#allocation5 + $0x58] sm:$0xff]  ;;  %v926_v20 = vld [vmem:[#allocation5 + $0x10] sm:$0xff] }
  0x15   :  { %505 = vmatpush.bf16.msra.mxu1 %v938_v5  ;;  %v944_v14 = vld [vmem:[#allocation5 + $0xa0] sm:$0xff]  ;;  %v943_v18 = vld [vmem:[#allocation5 + $0x98] sm:$0xff]  ;;  %v934_v21 = vld [vmem:[#allocation5 + $0x50] sm:$0xff] }
  0x16   :  { %519 = vmatpush.bf16.msra.mxu2 %v946_v6  ;;  %v952_v15 = vld [vmem:[#allocation5 + $0xe0] sm:$0xff]  ;;  %v951_v19 = vld [vmem:[#allocation5 + $0xd8] sm:$0xff]  ;;  %v942_v22 = vld [vmem:[#allocation5 + $0x90] sm:$0xff] }
  0x17   :  { %533 = vmatpush.bf16.msra.mxu3 %v954_v7  ;;  %v950_v23 = vld [vmem:[#allocation5 + $0xd0] sm:$0xff]  ;;  %v925_v24 = vld [vmem:[#allocation5 + $0x8] sm:$0xff]  ;;  %v924_v28 = vld [vmem:[#allocation5] sm:$0xff] }
  0x18   :  { %492 = vmatpush.bf16.msra.mxu0 %v929_v8  ;;  %v933_v25 = vld [vmem:[#allocation5 + $0x48] sm:$0xff]  ;;  %v932_v29 = vld [vmem:[#allocation5 + $0x40] sm:$0xff]  ;;  %v69_v30 = vld [vmem:[#allocation2] sm:$0xff] }
  0x19   :  { %506 = vmatpush.bf16.msra.mxu1 %v937_v9  ;;  %v941_v26 = vld [vmem:[#allocation5 + $0x88] sm:$0xff]  ;;  %v70_v32 = vld [vmem:[#allocation2 + $0x8] sm:$0xff]  ;;  %v77_v33 = vld [vmem:[#allocation2 + $0x40] sm:$0xff] }
  0x1a   :  { %520 = vmatpush.bf16.msra.mxu2 %v945_v10  ;;  %v949_v27 = vld [vmem:[#allocation5 + $0xc8] sm:$0xff]  ;;  %v963_v34 = vld [vmem:[#allocation5 + $0x138] sm:$0xff]  ;;  %v940_v36 = vld [vmem:[#allocation5 + $0x80] sm:$0xff]  ;;  %v84_v43 = vpack.c.bf16 %v77_v33, %v70_v32 }
  0x1b   :  { %534 = vmatpush.bf16.msra.mxu3 %v953_v11  ;;  %v76_v31 = vld [vmem:[#allocation2 + $0x38] sm:$0xff]  ;;  %v971_v35 = vld [vmem:[#allocation5 + $0x178] sm:$0xff]  ;;  %v948_v37 = vld [vmem:[#allocation5 + $0xc0] sm:$0xff] }
  0x1c   :  { %493 = vmatpush.bf16.msra.mxu0 %v928_v12  ;;  %v71_v38 = vld [vmem:[#allocation2 + $0x10] sm:$0xff]  ;;  %v78_v39 = vld [vmem:[#allocation2 + $0x48] sm:$0xff]  ;;  %v83_v40 = vpack.c.bf16 %v76_v31, %v69_v30  ;;  %v72_v41 = vld [vmem:[#allocation2 + $0x18] sm:$0xff] }
  0x1d   :  { %507 = vmatpush.bf16.msra.mxu1 %v936_v13  ;;  %v79_v42 = vld [vmem:[#allocation2 + $0x50] sm:$0xff]  ;;  %v962_v45 = vld [vmem:[#allocation5 + $0x130] sm:$0xff]  ;;  %v85_v47 = vpack.c.bf16 %v78_v39, %v71_v38  ;;  %v961_v49 = vld [vmem:[#allocation5 + $0x128] sm:$0xff] }
  0x1e   :  { %521 = vmatpush.bf16.msra.mxu2 %v944_v14  ;;  %v972_v44 = vld [vmem:[#allocation5 + $0x180] sm:$0xff]  ;;  %v970_v46 = vld [vmem:[#allocation5 + $0x170] sm:$0xff]  ;;  %v86_v48 = vpack.c.bf16 %v79_v42, %v72_v41  ;;  %v969_v50 = vld [vmem:[#allocation5 + $0x168] sm:$0xff] }
  0x1f   :  { %535 = vmatpush.bf16.msra.mxu3 %v952_v15  ;;  %v960_v51 = vld [vmem:[#allocation5 + $0x120] sm:$0xff]  ;;  %v959_v53 = vld [vmem:[#allocation5 + $0x118] sm:$0xff]  ;;  %v958_v57 = vld [vmem:[#allocation5 + $0x110] sm:$0xff] }
  0x20   :  { %494 = vmatpush.bf16.msra.mxu0 %v927_v16  ;;  %v968_v52 = vld [vmem:[#allocation5 + $0x160] sm:$0xff]  ;;  %v967_v54 = vld [vmem:[#allocation5 + $0x158] sm:$0xff]  ;;  %v966_v58 = vld [vmem:[#allocation5 + $0x150] sm:$0xff] }
  0x21   :  { %508 = vmatpush.bf16.msra.mxu1 %v935_v17  ;;  %v75_v55 = vld [vmem:[#allocation2 + $0x30] sm:$0xff]  ;;  %v82_v56 = vld [vmem:[#allocation2 + $0x68] sm:$0xff]  ;;  %v957_v60 = vld [vmem:[#allocation5 + $0x108] sm:$0xff] }
  0x22   :  { %522 = vmatpush.bf16.msra.mxu2 %v943_v18  ;;  %v89_v59 = vpack.c.bf16 %v82_v56, %v75_v55  ;;  %v965_v61 = vld [vmem:[#allocation5 + $0x148] sm:$0xff]  ;;  %v956_v62 = vld [vmem:[#allocation5 + $0x100] sm:$0xff]  ;;  %v73_v0 = vld [vmem:[#allocation2 + $0x20] sm:$0xff] }
  0x23   :  { %536 = vmatpush.bf16.msra.mxu3 %v951_v19  ;;  %v964_v63 = vld [vmem:[#allocation5 + $0x140] sm:$0xff]  ;;  %v80_v1 = vld [vmem:[#allocation2 + $0x58] sm:$0xff]  ;;  %v74_v2 = vld [vmem:[#allocation2 + $0x28] sm:$0xff] }
  0x24   :  { %495 = vmatpush.bf16.msra.mxu0 %v926_v20  ;;  %v81_v3 = vld [vmem:[#allocation2 + $0x60] sm:$0xff]  ;;  %v87_v4 = vpack.c.bf16 %v80_v1, %v73_v0  ;;  %v980_v6 = vld [vmem:[#allocation7 + $0x38] sm:$0xff]  ;;  %v979_v7 = vld [vmem:[#allocation7 + $0x30] sm:$0xff] }
  0x25   :  { %509 = vmatpush.bf16.msra.mxu1 %v934_v21  ;;  %v88_v5 = vpack.c.bf16 %v81_v3, %v74_v2  ;;  %v978_v8 = vld [vmem:[#allocation7 + $0x28] sm:$0xff]  ;;  %v977_v9 = vld [vmem:[#allocation7 + $0x20] sm:$0xff]  ;;  %v976_v10 = vld [vmem:[#allocation7 + $0x18] sm:$0xff] }
  0x26   :  { %523 = vmatpush.bf16.msra.mxu2 %v942_v22  ;;  %v975_v11 = vld [vmem:[#allocation7 + $0x10] sm:$0xff]  ;;  %v974_v12 = vld [vmem:[#allocation7 + $0x8] sm:$0xff]  ;;  %v973_v16 = vld [vmem:[#allocation7] sm:$0xff] }
  0x27   :  { %537 = vmatpush.bf16.msra.mxu3 %v950_v23  ;;  %v991_v17 = vld [vmem:[%s1155_s2] ss:$0 sm:$0xff] }
  0x28   :  { %496 = vmatpush.bf16.msra.mxu0 %v925_v24 }
  0x29   :  { %510 = vmatpush.bf16.msra.mxu1 %v933_v25 }
  0x2a   :  { %524 = vmatpush.bf16.msra.mxu2 %v941_v26 }
  0x2b   :  { %538 = vmatpush.bf16.msra.mxu3 %v949_v27 }
  0x2c   :  { %497 = vmatpush.bf16.msra.mxu0 %v924_v28 }
  0x2d   :  { %511 = vmatpush.bf16.msra.mxu1 %v932_v29 }
  0x2e   :  { %525 = vmatpush.bf16.msra.mxu2 %v940_v36 }
  0x2f   :  { %539 = vmatpush.bf16.msra.mxu3 %v948_v37  ;;  %498 = vmatmul.bf16.vlgmr.msra.gmra.mxu0 %v83_v40 }
  0x30   :  { %546 = vmatpush.bf16.msrb.mxu0 %v963_v34  ;;  %512 = vmatmul.bf16.vlgmr.msra.gmra.mxu1 %v84_v43 }
  0x31   :  { %560 = vmatpush.bf16.msrb.mxu1 %v971_v35  ;;  %526 = vmatmul.bf16.vlgmr.msra.gmra.mxu2 %v85_v47 }
  0x32   :  { %581 = vmatpush.bf16.msrb.mxu2 %v972_v44  ;;  %540 = vmatmul.bf16.vlgmr.msra.gmra.mxu3 %v86_v48 }
  0x33   :  { %659 = vmatpush.bf16.msrb.mxu3 %v980_v6 }
  0x34   :  { %547 = vmatpush.bf16.msrb.mxu0 %v962_v45 }
  0x35   :  { %561 = vmatpush.bf16.msrb.mxu1 %v970_v46  ;;  %v992_v46 = vld [vmem:[%s1157_s4] ss:$0 sm:$0xff] }
  0x37   :  { %660 = vmatpush.bf16.msrb.mxu3 %v979_v7 }
  0x38   :  { %548 = vmatpush.bf16.msrb.mxu0 %v961_v49 }
  0x39   :  { %562 = vmatpush.bf16.msrb.mxu1 %v969_v50 }
  0x3b   :  { %661 = vmatpush.bf16.msrb.mxu3 %v978_v8 }
  0x3c   :  { %549 = vmatpush.bf16.msrb.mxu0 %v960_v51 }
  0x3d   :  { %563 = vmatpush.bf16.msrb.mxu1 %v968_v52 }
  0x3f   :  { %662 = vmatpush.bf16.msrb.mxu3 %v977_v9 }
  0x40   :  { %550 = vmatpush.bf16.msrb.mxu0 %v959_v53 }
  0x41   :  { %564 = vmatpush.bf16.msrb.mxu1 %v967_v54  ;;  %891 = vmatmul.msk.bf16.vlgmr.msrb.gmra.mxu2 %vm486_vm0, %v89_v59 }
  0x43   :  { %663 = vmatpush.bf16.msrb.mxu3 %v976_v10 }
  0x44   :  { %551 = vmatpush.bf16.msrb.mxu0 %v958_v57 }
  0x45   :  { %565 = vmatpush.bf16.msrb.mxu1 %v966_v58 }
  0x47   :  { %664 = vmatpush.bf16.msrb.mxu3 %v975_v11 }
  0x48   :  { %552 = vmatpush.bf16.msrb.mxu0 %v957_v60 }
  0x49   :  { %566 = vmatpush.bf16.msrb.mxu1 %v965_v61 }
  0x4b   :  { %665 = vmatpush.bf16.msrb.mxu3 %v974_v12 }
  0x4c   :  { %553 = vmatpush.bf16.msrb.mxu0 %v956_v62 }
  0x4d   :  { %567 = vmatpush.bf16.msrb.mxu1 %v964_v63 }
  0x4f   :  { %554 = vmatmul.bf16.vlgmr.msrb.gmra.mxu0 %v87_v4  ;;  %666 = vmatpush.bf16.msrb.mxu3 %v973_v16 }
  0x50   :  { %568 = vmatmul.bf16.vlgmr.msrb.gmra.mxu1 %v88_v5 }
  0xac   :  { %v499_v13 = vpop.f32.mrf.mxu0 }
  0xad   :  { %v513_v14 = vpop.f32.mrf.mxu1  ;;  %v500_v18 = vadd.f32 %v991_v17, %v499_v13 }
  0xaf   :  { %v514_v22 = vadd.f32 %v513_v14, %v500_v18 }
  0xb4   :  { %v527_v15 = vpop.f32.mrf.mxu2  ;;  %v501_v19 = vpop.f32.mrf.mxu0 }
  0xb5   :  { %v515_v20 = vpop.f32.mrf.mxu1  ;;  %v541_v23 = vpop.f32.mrf.mxu3  ;;  %v502_v24 = vadd.f32 %v991_v17, %v501_v19  ;;  %v528_v25 = vadd.f32 %v527_v15, %v514_v22 }
  0xb7   :  { %v516_v26 = vadd.f32 %v515_v20, %v502_v24  ;;  %v542_v29 = vadd.f32 %v541_v23, %v528_v25 }
  0xbc   :  { %v529_v21 = vpop.f32.mrf.mxu2 }
  0xbd   :  { %v530_v31 = vadd.f32 %v529_v21, %v516_v26  ;;  %v543_v33 = vpop.f32.mrf.mxu3 }
  0xbf   :  { %v544_v34 = vadd.f32 %v543_v33, %v530_v31 }
  0xc4   :  { %v583_v30 = vpop.f32.mrf.mxu2 }
  0xcc   :  { %v555_v27 = vpop.f32.mrf.mxu0  ;;  %v585_v41 = vpop.f32.mrf.mxu2 }
  0xcd   :  { %v569_v28 = vpop.f32.mrf.mxu1  ;;  %v556_v32 = vadd.f32 %v555_v27, %v542_v29 }
  0xcf   :  { %v570_v35 = vadd.f32 %v569_v28, %v556_v32 }
  0xd1   :  { %v584_v39 = vadd.f32 %v583_v30, %v570_v35 }
  0xd3   :  { %v588_v43 = vmax.f32 %v584_v39, 0.0 }
  0xd4   :  { %v557_v36 = vpop.f32.mrf.mxu0 }
  0xd5   :  { %v558_v37 = vadd.f32 %v557_v36, %v544_v34  ;;  %v571_v38 = vpop.f32.mrf.mxu1 }
  0xd7   :  { %v572_v40 = vadd.f32 %v571_v38, %v558_v37 }
  0xd9   :  { %v586_v42 = vadd.f32 %v585_v41, %v572_v40 }
  0xdb   :  { %v589_v44 = vmax.f32 %v586_v42, 0.0 }
  0xdd   :  { %v590_v45 = vpack.c.bf16 %v589_v44, %v588_v43 }
  0xdf   :  { %667 = vmatmul.bf16.vlgmr.msrb.gmra.mxu3 %v590_v45 }
 0x162   :  { %v668_v47 = vpop.f32.mrf.mxu3 }
 0x163   :  { %v669_v48 = vadd.f32 %v992_v46, %v668_v47 }
 0x165   :  { %673 = vst [vmem:[#allocation8] sm:$0xff] %v669_v48 }
 0x16a   :  { %v670_v49 = vpop.f32.mrf.mxu3 }
 0x16b   :  { %v671_v50 = vadd.f32 %v992_v46, %v670_v49 }
 0x16d   :  { %674 = vst [vmem:[#allocation8 + $0x8] sm:$0xff] %v671_v50 }
 0x16e   :  { %687 = dma.vmem_to_hbm [thread:$0]  %s680_s13, 256, %s682_s16, [#allocation4], %s1103_s17, %s1103_s17, %s1104_s18  }
 0x16f   :  { %1093 = dma.done.wait [#allocation4], 256  }
 0x170   :  { %1094 = vsyncadd [#allocation4], 4294967040 }
 0x171   :  { %692 = vsyncpa [#allocation3], 1 }
 0x172   :  { %693 = vsyncpa [#allocation6], 1 }
 0x173   :  { %694 = vsyncpa [#allocation4], 1 }

</bundles_post_ra>
